<compile_context>
chip_gen: v5e
topology: v5e:2x2
jax: 0.10.0
libtpu: 0.0.40
codegen_flags: <defaults>
</compile_context>

<pallas_src>
import jax
import jax.numpy as jnp
from jax.experimental import pallas as pl
from jax.experimental.pallas import tpu as pltpu


def _vmem_capacity_bytes():
    """Per-core VMEM capacity; conservative (v7x, 64 MiB) fallback on failure."""
    try:
        return int(pltpu.get_tpu_info().vmem_capacity_bytes)
    except Exception:
        return 64 << 20


def _pick_tm(M, K, Nout, out_bytes, vmem_cap):
    """Token-tile size (second-minor dim of the x / out blocks)."""
    if M <= 512:
        # One grid step covering the whole token axis.  block == full array
        # dim is always legal (no 8/16-sublane divisibility issue, no pad)
        # and avoids splitting a tiny problem across steps on the
        # single-TensorCore v5e/v6e (each step costs ~0.35 us).
        return M
    # Large tiles amortize per-step overhead and reach ~85% of HBM roofline.
    # Gate by a VMEM budget: double-buffered bf16 x tile + out tile.
    budget = int(0.4 * vmem_cap)
    for cand in (1024, 512, 256, 128):
        if 2 * cand * (K * 2 + Nout * out_bytes) <= budget:
            return cand
    return 128


def dense_transformer_kernel(x_ref, w1_ref, w2_ref, bias_ref, o_ref):
    # x_ref:    (tm, K)          bf16 token tile (K = H*C, feature f = h*C + c)
    # w1_ref:   (K, bottleneck)  bf16 fc1 weight (in x out layout, grid-invariant)
    # w2_ref:   (bottleneck, N)  bf16 fc2 weight (grid-invariant)
    # bias_ref: (1, N)           f32 fused bias  b1 @ w2 + b2
    # o_ref:    (tm, N)          out_dtype (lane-dense: N = out_ch*Z >= 128)
    h = jnp.dot(x_ref[...], w1_ref[...], preferred_element_type=jnp.float32)
    y = jnp.dot(h.astype(jnp.bfloat16), w2_ref[...],
                preferred_element_type=jnp.float32)
    o_ref[...] = (y + bias_ref[...]).astype(o_ref.dtype)


def dense_transformer_forward(x, w1, b1, w2, b2, Z, out_ch,
                              out_dtype=jnp.bfloat16, tm=None):
    """x: (B, C, H, W) f32.  w1: (C*H, bottleneck), w2: (bottleneck, out_ch*Z).

    Returns (B, out_ch, Z, W) in out_dtype (bf16 by default; accuracy is
    already bounded by the bf16 MXU inputs — pass jnp.float32 only if the
    consumer strictly needs it, at the cost of 2x output writeback bytes).
    """
    B, C, H, W = x.shape
    K = C * H
    bottleneck = w1.shape[1]
    Nout = w2.shape[1]
    M = B * W
    out_bytes = jnp.dtype(out_dtype).itemsize

    # Layout glue (matches torch): (B,C,H,W) -> (B,W,H,C) -> (B*W, H*C).
    # Cast on the transposed view so the convert fuses into the transpose
    # copy under jit (single pass over x, and the kernel then reads bf16).
    x2d = jnp.transpose(x, (0, 3, 2, 1)).astype(jnp.bfloat16).reshape(M, K)

    # bf16 MXU operands for the weights (tiny, one-time); fused bias in f32
    # (computed from the original f32 weights for accuracy).
    w1_bf = w1.astype(jnp.bfloat16)
    w2_bf = w2.astype(jnp.bfloat16)
    b_fused = (b1.astype(jnp.float32) @ w2.astype(jnp.float32)
               + b2.astype(jnp.float32)).reshape(1, Nout)

    vmem_cap = _vmem_capacity_bytes()
    if tm is None:
        tm = _pick_tm(M, K, Nout, out_bytes, vmem_cap)
    tm = min(tm, M)
    grid_m = pl.cdiv(M, tm)   # uneven last block handled by Pallas masking

    # Single-buffer the grid-invariant operands only when their default
    # double-buffered residency would matter on v7x's 64 MiB VMEM.
    weights_2buf_bytes = 2 * (K * bottleneck + bottleneck * Nout) * 2
    single_buffer_weights = weights_2buf_bytes > (16 << 20)

    def _invariant_spec(shape):
        if single_buffer_weights:
            return pl.BlockSpec(shape, lambda i: (0, 0),
                                pipeline_mode=pl.Buffered(1))
        return pl.BlockSpec(shape, lambda i: (0, 0))

    # Exact VMEM residency * 1.25 headroom, capped at 75% of physical VMEM.
    wbufs = 1 if single_buffer_weights else 2
    exact_bytes = (2 * tm * (K * 2 + Nout * out_bytes)
                   + wbufs * ((K * bottleneck + bottleneck * Nout) * 2
                              + Nout * 4))
    vmem_limit = int(min(max(exact_bytes * 1.25, 32 << 20), 0.75 * vmem_cap))

    out2d = pl.pallas_call(
        dense_transformer_kernel,
        out_shape=jax.ShapeDtypeStruct((M, Nout), out_dtype),
        grid_spec=pltpu.PrefetchScalarGridSpec(
            num_scalar_prefetch=0,
            grid=(grid_m,),
            in_specs=[
                pl.BlockSpec((tm, K), lambda i: (i, 0)),   # x token tile
                _invariant_spec((K, bottleneck)),          # fc1 W (grid-invariant)
                _invariant_spec((bottleneck, Nout)),       # fc2 W (grid-invariant)
                _invariant_spec((1, Nout)),                # fused bias
            ],
            out_specs=pl.BlockSpec((tm, Nout), lambda i: (i, 0)),
        ),
        compiler_params=pltpu.CompilerParams(
            dimension_semantics=("parallel",),
            vmem_limit_bytes=vmem_limit,
        ),
    )(x2d, w1_bf, w2_bf, b_fused)

    # (B*W, Z*out_ch) -> (B, W, Z, out_ch) -> (B, out_ch, Z, W).
    # Kept out of the kernel: moving it in would make W (<128) the output
    # lane dim -> masked partial stores (worst lane-layout penalty).
    out = out2d.reshape(B, W, Z, out_ch)
    return jnp.transpose(out, (0, 3, 2, 1))


def _reference_forward(x, w1, b1, w2, b2, Z, out_ch):
    """Pure-JAX f32 reference mirroring the PyTorch forward exactly."""
    B, C, H, W = x.shape
    xt = jnp.transpose(x, (0, 3, 2, 1)).reshape(B, W, C * H)
    h = xt @ w1 + b1
    y = h @ w2 + b2
    y = y.reshape(B, W, Z, out_ch)
    return jnp.transpose(y, (0, 3, 2, 1))


if __name__ == "__main__":
    # Small shapes consistent with the module.
    B, C, H, W = 2, 4, 16, 16
    Z = 8
    bottleneck = 128
    out_ch = 64

    key = jax.random.PRNGKey(0)
    kx, k1, k2, k3, k4 = jax.random.split(key, 5)

    x = jax.random.normal(kx, (B, C, H, W), dtype=jnp.float32)

    # Parameters stored as (in, out) for x @ W layout (== nn.Linear weight^T).
    w1 = jax.random.normal(k1, (C * H, bottleneck), dtype=jnp.float32) * 0.05
    b1 = jax.random.normal(k2, (bottleneck,), dtype=jnp.float32) * 0.05
    w2 = jax.random.normal(k3, (bottleneck, out_ch * Z), dtype=jnp.float32) * 0.05
    b2 = jax.random.normal(k4, (out_ch * Z,), dtype=jnp.float32) * 0.05

    # Jit the whole forward so the transpose + bf16 cast (and the output
    # reshape/transpose) fuse into single XLA passes around the kernel.
    fwd = jax.jit(dense_transformer_forward,
                  static_argnames=("Z", "out_ch", "out_dtype", "tm"))

    out = fwd(x, w1, b1, w2, b2, Z=Z, out_ch=out_ch)
    out = jax.block_until_ready(out)

    assert out.shape == (B, out_ch, Z, W), out.shape

    ref = _reference_forward(x, w1, b1, w2, b2, Z, out_ch)
    # bf16 MXU inputs + bf16 writeback with f32 accumulation: loosened tol.
    out_f32 = out.astype(jnp.float32)
    assert jnp.allclose(out_f32, ref, atol=3e-2, rtol=3e-2), float(
        jnp.max(jnp.abs(out_f32 - ref)))

    print("KERNEL_OK")
</pallas_src>

<mosaic_0001>
module attributes {stable_mosaic.version = 11 : i64} {
  func.func @dense_transformer_kernel(%arg0: i32, %arg1: memref<32x64xbf16, #tpu.memory_space<vmem>>, %arg2: memref<64x128xbf16, #tpu.memory_space<vmem>>, %arg3: memref<128x512xbf16, #tpu.memory_space<vmem>>, %arg4: memref<1x512xf32, #tpu.memory_space<vmem>>, %arg5: memref<32x512xbf16, #tpu.memory_space<vmem>>) attributes {dimension_semantics = [#tpu.dimension_semantics<parallel>], iteration_bounds = array<i64: 1>, scalar_prefetch = 0 : i64, scratch_operands = 0 : i64, tpu.core_type = #tpu.core_type<tc>, window_params = [{transform_indices = @transform_0, window_bounds = array<i64: 32, 64>}, {pipeline_mode = #tpu.pipeline_mode<synchronous>, transform_indices = @transform_1, window_bounds = array<i64: 64, 128>}, {pipeline_mode = #tpu.pipeline_mode<synchronous>, transform_indices = @transform_2, window_bounds = array<i64: 128, 512>}, {pipeline_mode = #tpu.pipeline_mode<synchronous>, transform_indices = @transform_3, window_bounds = array<i64: 1, 512>}, {transform_indices = @transform_4, window_bounds = array<i64: 32, 512>}]} {
    %c0 = arith.constant 0 : index
    %c0_0 = arith.constant 0 : index
    %0 = vector.load %arg1[%c0, %c0_0] : memref<32x64xbf16, #tpu.memory_space<vmem>>, vector<32x64xbf16>
    %c0_1 = arith.constant 0 : index
    %c0_2 = arith.constant 0 : index
    %1 = vector.load %arg2[%c0_1, %c0_2] : memref<64x128xbf16, #tpu.memory_space<vmem>>, vector<64x128xbf16>
    %cst = arith.constant dense<0.000000e+00> : vector<32x128xf32>
    %2 = tpu.matmul %0, %1, %cst {dimension_numbers = #tpu.dot_dimension_numbers<[1], [0], [0], [1], [0, 0, 1, 1], [], []>} : vector<32x64xbf16>, vector<64x128xbf16>, vector<32x128xf32> -> vector<32x128xf32>
    %3 = arith.truncf %2 : vector<32x128xf32> to vector<32x128xbf16>
    %c0_3 = arith.constant 0 : index
    %c0_4 = arith.constant 0 : index
    %4 = vector.load %arg3[%c0_3, %c0_4] : memref<128x512xbf16, #tpu.memory_space<vmem>>, vector<128x512xbf16>
    %cst_5 = arith.constant dense<0.000000e+00> : vector<32x512xf32>
    %5 = tpu.matmul %3, %4, %cst_5 {dimension_numbers = #tpu.dot_dimension_numbers<[1], [0], [0], [1], [0, 0, 1, 1], [], []>} : vector<32x128xbf16>, vector<128x512xbf16>, vector<32x512xf32> -> vector<32x512xf32>
    %c0_6 = arith.constant 0 : index
    %c0_7 = arith.constant 0 : index
    %6 = vector.load %arg4[%c0_6, %c0_7] : memref<1x512xf32, #tpu.memory_space<vmem>>, vector<1x512xf32>
    %7 = vector.broadcast %6 : vector<1x512xf32> to vector<32x512xf32>
    %8 = arith.addf %5, %7 : vector<32x512xf32>
    %9 = arith.truncf %8 : vector<32x512xf32> to vector<32x512xbf16>
    %c0_8 = arith.constant 0 : index
    %c0_9 = arith.constant 0 : index
    %10 = vector.load %arg5[%c0_8, %c0_9] : memref<32x512xbf16, #tpu.memory_space<vmem>>, vector<32x512xbf16>
    tpu.vector_store %arg5[%c0_8, %c0_9], %9 {strides = array<i32>} : memref<32x512xbf16, #tpu.memory_space<vmem>>, vector<32x512xbf16>,
    return
  }
  func.func @transform_0(%arg0: i32) -> (i32, i32) {
    %c0_i32 = arith.constant 0 : i32
    %c0_i32_0 = arith.constant 0 : i32
    return %arg0, %c0_i32 : i32, i32
  }
  func.func @transform_1(%arg0: i32) -> (i32, i32) {
    %c0_i32 = arith.constant 0 : i32
    %c0_i32_0 = arith.constant 0 : i32
    %c0_i32_1 = arith.constant 0 : i32
    return %c0_i32, %c0_i32_0 : i32, i32
  }
  func.func @transform_2(%arg0: i32) -> (i32, i32) {
    %c0_i32 = arith.constant 0 : i32
    %c0_i32_0 = arith.constant 0 : i32
    %c0_i32_1 = arith.constant 0 : i32
    return %c0_i32, %c0_i32_0 : i32, i32
  }
  func.func @transform_3(%arg0: i32) -> (i32, i32) {
    %c0_i32 = arith.constant 0 : i32
    %c0_i32_0 = arith.constant 0 : i32
    %c0_i32_1 = arith.constant 0 : i32
    return %c0_i32, %c0_i32_0 : i32, i32
  }
  func.func @transform_4(%arg0: i32) -> (i32, i32) {
    %c0_i32 = arith.constant 0 : i32
    %c0_i32_0 = arith.constant 0 : i32
    return %arg0, %c0_i32 : i32, i32
  }
}

</mosaic_0001>

<bundles_post_ra>
// kernel: dense_transformer_forward.1
= control target key start
LH: loop header
LB: loop body
LE: loop exit
PB: predicated region body
PF: predicated region fallthrough
CT: control target
= control target key end

     0   :  { %vm64_vm0 = vcmask 523264   ;;  %s846_s1 = inlined_call_operand.vmem [shape: bf16[64,128], index: 1, kind: input, shape index: {}]   ;;  %s847_s2 = inlined_call_operand.vmem [shape: bf16[128,512], index: 2, kind: input, shape index: {}]   ;;  %s848_s0 = inlined_call_operand.vmem [shape: bf16[32,64], index: 0, kind: input, shape index: {}]   ;;  %s849_s3 = inlined_call_operand.vmem [shape: f32[1,512], index: 3, kind: input, shape index: {}]   ;;  %s850_s4 = inlined_call_operand.vmem [shape: bf16[32,512], index: 4, kind: output, shape index: {}]  }
   0x1   :  { %v549_v0 = vld [vmem:[%s846_s1 + $0x18] sm:$0xff]  ;;  %v548_v1 = vld [vmem:[%s846_s1 + $0x10] sm:$0xff]  ;;  %v530_v2 = vld [vmem:[%s847_s2 + $0xe0] sm:$0xf] }
   0x2   :  { %75 = vmatpush.bf16.msra.mxu0 %v549_v0  ;;  %v580_v3 = vld [vmem:[%s847_s2 + $0xec] sm:$0xf0]  ;;  %v578_v4 = vld [vmem:[%s847_s2 + $0xe4] sm:$0xf]  ;;  %v532_v6 = vld [vmem:[%s847_s2 + $0xf0] sm:$0xf0] }
   0x3   :  { %v531_v5 = vor.u32 %v580_v3, %v530_v2  ;;  %v538_v7 = vld [vmem:[%s847_s2 + $0xe8] sm:$0xf]  ;;  %v581_v8 = vld [vmem:[%s847_s2 + $0xf4] sm:$0xf0]  ;;  %v535_v10 = vor.u32 %v578_v4, %v532_v6  ;;  %v514_v12 = vld [vmem:[%s847_s2 + $0xc0] sm:$0xf] }
   0x4   :  { %v547_v9 = vld [vmem:[%s846_s1 + $0x8] sm:$0xff]  ;;  %v539_v11 = vor.u32 %v581_v8, %v538_v7  ;;  %v576_v13 = vld [vmem:[%s847_s2 + $0xcc] sm:$0xf0]  ;;  %v574_v14 = vld [vmem:[%s847_s2 + $0xc4] sm:$0xf] }
   0x5   :  { %294 = vmatpush.bf16.msra.mxu1 %v531_v5  ;;  %v516_v15 = vld [vmem:[%s847_s2 + $0xd0] sm:$0xf0]  ;;  %313 = vmatpush.bf16.msra.mxu2 %v535_v10  ;;  %v579_v16 = vld [vmem:[%s847_s2 + $0xec] sm:$0xf]  ;;  %v515_v17 = vor.u32 %v576_v13, %v514_v12  ;;  %v522_v19 = vld [vmem:[%s847_s2 + $0xc8] sm:$0xf] }
   0x6   :  { %76 = vmatpush.bf16.msra.mxu0 %v548_v1  ;;  %v519_v18 = vor.u32 %v574_v14, %v516_v15  ;;  %v577_v20 = vld [vmem:[%s847_s2 + $0xd4] sm:$0xf0]  ;;  %332 = vmatpush.bf16.msra.mxu3 %v539_v11  ;;  %v540_v21 = vld [vmem:[%s847_s2 + $0xf8] sm:$0xf0]  ;;  %v498_v23 = vld [vmem:[%s847_s2 + $0xa0] sm:$0xf] }
   0x7   :  { %v523_v22 = vor.u32 %v577_v20, %v522_v19  ;;  %v572_v24 = vld [vmem:[%s847_s2 + $0xac] sm:$0xf0]  ;;  %v570_v25 = vld [vmem:[%s847_s2 + $0xa4] sm:$0xf]  ;;  %v500_v26 = vld [vmem:[%s847_s2 + $0xb0] sm:$0xf0]  ;;  %v543_v34 = vor.u32 %v579_v16, %v540_v21 }
   0x8   :  { %v506_v27 = vld [vmem:[%s847_s2 + $0xa8] sm:$0xf]  ;;  %v499_v28 = vor.u32 %v572_v24, %v498_v23  ;;  %v573_v29 = vld [vmem:[%s847_s2 + $0xb4] sm:$0xf0]  ;;  %v546_v30 = vld [vmem:[%s846_s1] sm:$0xff]  ;;  %v503_v31 = vor.u32 %v570_v25, %v500_v26 }
   0x9   :  { %295 = vmatpush.bf16.msra.mxu1 %v515_v17  ;;  %314 = vmatpush.bf16.msra.mxu2 %v519_v18  ;;  %v482_v32 = vld [vmem:[%s847_s2 + $0x80] sm:$0xf]  ;;  %v568_v33 = vld [vmem:[%s847_s2 + $0x8c] sm:$0xf0]  ;;  %v575_v35 = vld [vmem:[%s847_s2 + $0xcc] sm:$0xf]  ;;  %v507_v36 = vor.u32 %v573_v29, %v506_v27 }
   0xa   :  { %77 = vmatpush.bf16.msra.mxu0 %v547_v9  ;;  %333 = vmatpush.bf16.msra.mxu3 %v523_v22  ;;  %v566_v37 = vld [vmem:[%s847_s2 + $0x84] sm:$0xf]  ;;  %v484_v38 = vld [vmem:[%s847_s2 + $0x90] sm:$0xf0]  ;;  %v524_v39 = vld [vmem:[%s847_s2 + $0xd8] sm:$0xf0]  ;;  %v483_v43 = vor.u32 %v568_v33, %v482_v32 }
   0xb   :  { %v490_v40 = vld [vmem:[%s847_s2 + $0x88] sm:$0xf]  ;;  %v569_v41 = vld [vmem:[%s847_s2 + $0x94] sm:$0xf0]  ;;  %v544_v42 = vld [vmem:[%s848_s0] sm:$0xff]  ;;  %v487_v44 = vor.u32 %v566_v37, %v484_v38  ;;  %v527_v47 = vor.u32 %v575_v35, %v524_v39 }
   0xc   :  { %v466_v45 = vld [vmem:[%s847_s2 + $0x60] sm:$0xf]  ;;  %v564_v46 = vld [vmem:[%s847_s2 + $0x6c] sm:$0xf0]  ;;  %v571_v48 = vld [vmem:[%s847_s2 + $0xac] sm:$0xf]  ;;  %v491_v49 = vor.u32 %v569_v41, %v490_v40 }
   0xd   :  { %296 = vmatpush.bf16.msra.mxu1 %v499_v28  ;;  %315 = vmatpush.bf16.msra.mxu2 %v503_v31  ;;  %v562_v50 = vld [vmem:[%s847_s2 + $0x64] sm:$0xf]  ;;  %v468_v51 = vld [vmem:[%s847_s2 + $0x70] sm:$0xf0]  ;;  %v508_v52 = vld [vmem:[%s847_s2 + $0xb8] sm:$0xf0]  ;;  %v467_v55 = vor.u32 %v564_v46, %v466_v45 }
   0xe   :  { %78 = vmatpush.bf16.msra.mxu0 %v546_v30  ;;  %334 = vmatpush.bf16.msra.mxu3 %v507_v36  ;;  %v474_v53 = vld [vmem:[%s847_s2 + $0x68] sm:$0xf]  ;;  %v565_v54 = vld [vmem:[%s847_s2 + $0x74] sm:$0xf0]  ;;  %v471_v56 = vor.u32 %v562_v50, %v468_v51  ;;  %v511_v57 = vor.u32 %v571_v48, %v508_v52  ;;  %v567_v59 = vld [vmem:[%s847_s2 + $0x8c] sm:$0xf] }
   0xf   :  { %v475_v58 = vor.u32 %v565_v54, %v474_v53  ;;  %v492_v60 = vld [vmem:[%s847_s2 + $0x98] sm:$0xf0]  ;;  %v563_v62 = vld [vmem:[%s847_s2 + $0x6c] sm:$0xf]  ;;  %v450_v2 = vld [vmem:[%s847_s2 + $0x40] sm:$0xf] }
  0x10   :  { %v495_v61 = vor.u32 %v567_v59, %v492_v60  ;;  %v476_v63 = vld [vmem:[%s847_s2 + $0x78] sm:$0xf0]  ;;  %v545_v1 = vld [vmem:[%s848_s0 + $0x8] sm:$0xff]  ;;  %v560_v3 = vld [vmem:[%s847_s2 + $0x4c] sm:$0xf0] }
  0x11   :  { %414 = vmatmul.msk.bf16.vlgmr.msra.gmra.mxu0 %vm64_vm0, %v544_v42  ;;  %297 = vmatpush.bf16.msra.mxu1 %v483_v43  ;;  %v479_v0 = vor.u32 %v563_v62, %v476_v63  ;;  %v558_v4 = vld [vmem:[%s847_s2 + $0x44] sm:$0xf]  ;;  %v451_v5 = vor.u32 %v560_v3, %v450_v2  ;;  %v452_v6 = vld [vmem:[%s847_s2 + $0x50] sm:$0xf0]  ;;  %v458_v7 = vld [vmem:[%s847_s2 + $0x48] sm:$0xf] }
  0x12   :  { %351 = vmatpush.bf16.msrb.mxu0 %v543_v34  ;;  %316 = vmatpush.bf16.msra.mxu2 %v487_v44  ;;  %v561_v8 = vld [vmem:[%s847_s2 + $0x54] sm:$0xf0]  ;;  %v455_v9 = vor.u32 %v558_v4, %v452_v6  ;;  %v559_v11 = vld [vmem:[%s847_s2 + $0x4c] sm:$0xf]  ;;  %v460_v12 = vld [vmem:[%s847_s2 + $0x58] sm:$0xf0] }
  0x13   :  { %335 = vmatpush.bf16.msra.mxu3 %v491_v49  ;;  %v459_v10 = vor.u32 %v561_v8, %v458_v7  ;;  %v463_v13 = vor.u32 %v559_v11, %v460_v12  ;;  %v434_v14 = vld [vmem:[%s847_s2 + $0x20] sm:$0xf]  ;;  %v556_v15 = vld [vmem:[%s847_s2 + $0x2c] sm:$0xf0]  ;;  %v554_v16 = vld [vmem:[%s847_s2 + $0x24] sm:$0xf] }
  0x14   :  { %v435_v17 = vor.u32 %v556_v15, %v434_v14  ;;  %v436_v18 = vld [vmem:[%s847_s2 + $0x30] sm:$0xf0]  ;;  %v442_v19 = vld [vmem:[%s847_s2 + $0x28] sm:$0xf]  ;;  %v557_v20 = vld [vmem:[%s847_s2 + $0x34] sm:$0xf0] }
  0x15   :  { %298 = vmatpush.bf16.msra.mxu1 %v467_v55  ;;  %v439_v21 = vor.u32 %v554_v16, %v436_v18  ;;  %v443_v22 = vor.u32 %v557_v20, %v442_v19  ;;  %v555_v23 = vld [vmem:[%s847_s2 + $0x2c] sm:$0xf]  ;;  %v444_v24 = vld [vmem:[%s847_s2 + $0x38] sm:$0xf0]  ;;  %v418_v26 = vld [vmem:[%s847_s2] sm:$0xf] }
  0x16   :  { %352 = vmatpush.bf16.msrb.mxu0 %v527_v47  ;;  %317 = vmatpush.bf16.msra.mxu2 %v471_v56  ;;  %v447_v25 = vor.u32 %v555_v23, %v444_v24  ;;  %v552_v27 = vld [vmem:[%s847_s2 + $0xc] sm:$0xf0]  ;;  %v550_v28 = vld [vmem:[%s847_s2 + $0x4] sm:$0xf]  ;;  %v420_v30 = vld [vmem:[%s847_s2 + $0x10] sm:$0xf0] }
  0x17   :  { %336 = vmatpush.bf16.msra.mxu3 %v475_v58  ;;  %v419_v29 = vor.u32 %v552_v27, %v418_v26  ;;  %v426_v31 = vld [vmem:[%s847_s2 + $0x8] sm:$0xf]  ;;  %v553_v32 = vld [vmem:[%s847_s2 + $0x14] sm:$0xf0]  ;;  %v423_v33 = vor.u32 %v550_v28, %v420_v30  ;;  %v551_v35 = vld [vmem:[%s847_s2 + $0xc] sm:$0xf] }
  0x18   :  { %v427_v34 = vor.u32 %v553_v32, %v426_v31  ;;  %v428_v36 = vld [vmem:[%s847_s2 + $0x18] sm:$0xf0]  ;;  %v124_v44 = vld [vmem:[%s849_s3] sm:$0xf] }
  0x19   :  { %299 = vmatpush.bf16.msra.mxu1 %v451_v5  ;;  %v431_v37 = vor.u32 %v551_v35, %v428_v36  ;;  %v126_v47 = vperm.slane %v124_v44, 0  ;;  %v127_v48 = vperm.slane %v124_v44, 1  ;;  %v129_v49 = vperm.slane %v124_v44, 3 }
  0x1a   :  { %353 = vmatpush.bf16.msrb.mxu0 %v511_v57  ;;  %318 = vmatpush.bf16.msra.mxu2 %v455_v9  ;;  %v128_v50 = vperm.slane %v124_v44, 2 }
  0x1b   :  { %337 = vmatpush.bf16.msra.mxu3 %v459_v10 }
  0x1d   :  { %300 = vmatpush.bf16.msra.mxu1 %v435_v17 }
  0x1e   :  { %354 = vmatpush.bf16.msrb.mxu0 %v495_v61  ;;  %319 = vmatpush.bf16.msra.mxu2 %v439_v21 }
  0x1f   :  { %338 = vmatpush.bf16.msra.mxu3 %v443_v22 }
  0x21   :  { %415 = vmatmul.msk.bf16.gmra.mxu0 %vm64_vm0, %v545_v1  ;;  %301 = vmatpush.bf16.msra.mxu1 %v419_v29 }
  0x22   :  { %355 = vmatpush.bf16.msrb.mxu0 %v479_v0  ;;  %320 = vmatpush.bf16.msra.mxu2 %v423_v33 }
  0x23   :  { %339 = vmatpush.bf16.msra.mxu3 %v427_v34 }
  0x26   :  { %356 = vmatpush.bf16.msrb.mxu0 %v463_v13 }
  0x2a   :  { %357 = vmatpush.bf16.msrb.mxu0 %v447_v25 }
  0x2e   :  { %358 = vmatpush.bf16.msrb.mxu0 %v431_v37 }
  0x8e   :  { %v80_v38 = vpop.f32.mrf.mxu0 }
  0x96   :  { %v82_v39 = vpop.f32.mrf.mxu0 }
  0x97   :  { %v90_v40 = vpack.c.bf16 %v82_v39, %v80_v38 }
  0x99   :  { %302 = vmatmul.bf16.vlgmr.msra.gmra.mxu1 %v90_v40  ;;  %321 = vmatmul.bf16.vlgmr.msra.gmra.mxu2 %v90_v40 }
  0x9a   :  { %340 = vmatmul.bf16.vlgmr.msra.gmra.mxu3 %v90_v40  ;;  %359 = vmatmul.bf16.vlgmr.msrb.gmra.mxu0 %v90_v40 }
  0x9e   :  { %v85_v41 = vpop.f32.mrf.mxu0 }
  0xa6   :  { %v87_v42 = vpop.f32.mrf.mxu0 }
  0xa7   :  { %v91_v43 = vpack.c.bf16 %v87_v42, %v85_v41 }
  0xa9   :  { %307 = vmatmul.bf16.gmra.mxu1 %v91_v43  ;;  %326 = vmatmul.bf16.gmra.mxu2 %v91_v43 }
  0xaa   :  { %345 = vmatmul.bf16.gmra.mxu3 %v91_v43  ;;  %364 = vmatmul.bf16.gmra.mxu0 %v91_v43 }
 0x116   :  { %v303_v45 = vpop.f32.mrf.mxu1 }
 0x117   :  { %v360_v46 = vpop.f32.mrf.mxu0  ;;  %v304_v52 = vadd.f32 %v303_v45, %v126_v47 }
 0x118   :  { %v361_v55 = vadd.f32 %v360_v46, %v129_v49 }
 0x11c   :  { %v322_v51 = vpop.f32.mrf.mxu2 }
 0x11d   :  { %v323_v53 = vadd.f32 %v322_v51, %v127_v48  ;;  %v341_v54 = vpop.f32.mrf.mxu3 }
 0x11e   :  { %v342_v56 = vadd.f32 %v341_v54, %v128_v50  ;;  %v305_v57 = vpop.f32.mrf.mxu1 }
 0x11f   :  { %v370_v58 = vpack.c.bf16 %v323_v53, %v304_v52  ;;  %v362_v59 = vpop.f32.mrf.mxu0  ;;  %v306_v62 = vadd.f32 %v305_v57, %v126_v47 }
 0x120   :  { %v371_v60 = vpack.c.bf16 %v361_v55, %v342_v56  ;;  %v363_v1 = vadd.f32 %v362_v59, %v129_v49 }
 0x121   :  { %378 = vst [vmem:[%s850_s4] sm:$0xff] %v370_v58 }
 0x122   :  { %379 = vst [vmem:[%s850_s4 + $0x8] sm:$0xff] %v371_v60 }
 0x124   :  { %v324_v61 = vpop.f32.mrf.mxu2 }
 0x125   :  { %v325_v63 = vadd.f32 %v324_v61, %v127_v48  ;;  %v343_v0 = vpop.f32.mrf.mxu3 }
 0x126   :  { %v344_v2 = vadd.f32 %v343_v0, %v128_v50  ;;  %v308_v5 = vpop.f32.mrf.mxu1 }
 0x127   :  { %v372_v3 = vpack.c.bf16 %v325_v63, %v306_v62  ;;  %v365_v6 = vpop.f32.mrf.mxu0  ;;  %v309_v8 = vadd.f32 %v308_v5, %v126_v47 }
 0x128   :  { %v373_v4 = vpack.c.bf16 %v363_v1, %v344_v2  ;;  %v366_v11 = vadd.f32 %v365_v6, %v129_v49 }
 0x129   :  { %380 = vst [vmem:[%s850_s4 + $0x10] sm:$0xff] %v372_v3 }
 0x12a   :  { %381 = vst [vmem:[%s850_s4 + $0x18] sm:$0xff] %v373_v4 }
 0x12c   :  { %v327_v7 = vpop.f32.mrf.mxu2 }
 0x12d   :  { %v328_v9 = vadd.f32 %v327_v7, %v127_v48  ;;  %v346_v10 = vpop.f32.mrf.mxu3 }
 0x12e   :  { %v347_v12 = vadd.f32 %v346_v10, %v128_v50  ;;  %v310_v15 = vpop.f32.mrf.mxu1 }
 0x12f   :  { %v374_v13 = vpack.c.bf16 %v328_v9, %v309_v8  ;;  %v367_v16 = vpop.f32.mrf.mxu0  ;;  %v311_v18 = vadd.f32 %v310_v15, %v126_v47 }
 0x130   :  { %v375_v14 = vpack.c.bf16 %v366_v11, %v347_v12  ;;  %v368_v21 = vadd.f32 %v367_v16, %v129_v49 }
 0x131   :  { %382 = vst [vmem:[%s850_s4 + $0x20] sm:$0xff] %v374_v13 }
 0x132   :  { %383 = vst [vmem:[%s850_s4 + $0x28] sm:$0xff] %v375_v14 }
 0x134   :  { %v329_v17 = vpop.f32.mrf.mxu2 }
 0x135   :  { %v330_v19 = vadd.f32 %v329_v17, %v127_v48  ;;  %v348_v20 = vpop.f32.mrf.mxu3 }
 0x136   :  { %v349_v22 = vadd.f32 %v348_v20, %v128_v50 }
 0x137   :  { %v376_v23 = vpack.c.bf16 %v330_v19, %v311_v18 }
 0x138   :  { %v377_v24 = vpack.c.bf16 %v368_v21, %v349_v22 }
 0x139   :  { %384 = vst [vmem:[%s850_s4 + $0x30] sm:$0xff] %v376_v23 }
 0x13a   :  { %385 = vst [vmem:[%s850_s4 + $0x38] sm:$0xff] %v377_v24 }

</bundles_post_ra>
